<compile_context>
chip_gen: v5e
topology: v5e:2x2
jax: 0.10.0
libtpu: 0.0.40
codegen_flags: <defaults>
</compile_context>

<pallas_src>
import functools

import jax
import jax.numpy as jnp
from jax.experimental import pallas as pl
from jax.experimental.pallas import tpu as pltpu


# ----------------------------------------------------------------------------
# Pallas kernel
# ----------------------------------------------------------------------------
def _melbert_head_kernel(inv_s,
                         seq_ref, seq2_ref, tm_ref, tm2_ref, pooled_ref,
                         w_spv_p_ref, w_spv_t_ref, b_spv_ref,
                         w_mip_t2_ref, w_mip_t_ref, b_mip_ref,
                         w_cls_spv_ref, w_cls_mip_ref, b_cls_ref,
                         out_ref,
                         acc_t_ref, acc_t2_ref):
    s_idx = pl.program_id(1)

    @pl.when(s_idx == 0)
    def _init():
        acc_t_ref[...] = jnp.zeros_like(acc_t_ref)
        acc_t2_ref[...] = jnp.zeros_like(acc_t2_ref)

    # Target-masked partial sums for this sequence window: VPU multiply +
    # sublane reduce into 2-D f32 accumulators.  The streaming phase is
    # HBM-bound, so this work hides under the tile DMAs; the MXU stays idle.
    seq = seq_ref[...].astype(jnp.float32)       # [tb, ts, H]
    seq2 = seq2_ref[...].astype(jnp.float32)     # [tb, ts, H]
    tm = tm_ref[...]                             # [tb, ts, 1]  f32 0/1 mask
    tm2 = tm2_ref[...]                           # [tb, ts, 1]
    acc_t_ref[...] += jnp.sum(seq * tm, axis=1)      # [tb, H]
    acc_t2_ref[...] += jnp.sum(seq2 * tm2, axis=1)   # [tb, H]

    @pl.when(s_idx == pl.num_programs(1) - 1)
    def _finalize():
        # Original module's .mean(1): divide masked sum by S (not mask.sum()).
        target = acc_t_ref[...] * inv_s               # [tb, H] f32
        target2 = acc_t2_ref[...] * inv_s             # [tb, H] f32
        pooled = pooled_ref[...]                      # [tb, H] f32

        cdt = w_spv_p_ref.dtype                       # bf16 weights
        spv = (jnp.dot(pooled.astype(cdt), w_spv_p_ref[...],
                       preferred_element_type=jnp.float32)
               + jnp.dot(target.astype(cdt), w_spv_t_ref[...],
                         preferred_element_type=jnp.float32)
               + b_spv_ref[...])                      # [tb, CH] f32
        mip = (jnp.dot(target2.astype(cdt), w_mip_t2_ref[...],
                       preferred_element_type=jnp.float32)
               + jnp.dot(target.astype(cdt), w_mip_t_ref[...],
                         preferred_element_type=jnp.float32)
               + b_mip_ref[...])                      # [tb, CH] f32

        # Tiny classifier kept in f32.
        logits = (jnp.dot(spv, w_cls_spv_ref[...],
                          preferred_element_type=jnp.float32)
                  + jnp.dot(mip, w_cls_mip_ref[...],
                            preferred_element_type=jnp.float32)
                  + b_cls_ref[...])                   # [tb, L] f32

        m = jnp.max(logits, axis=1, keepdims=True)
        z = logits - m
        lse = jnp.log(jnp.sum(jnp.exp(z), axis=1, keepdims=True))
        out_ref[...] = (z - lse).astype(out_ref.dtype)


# ----------------------------------------------------------------------------
# Tile sizing helpers (VMEM-capacity aware)
# ----------------------------------------------------------------------------
def _round_up(x, m):
    return -(-x // m) * m


def _vmem_capacity_bytes():
    try:
        return int(pltpu.get_tpu_info().vmem_capacity_bytes)
    except Exception:
        return 64 << 20          # conservative: v7x per-TensorCore capacity


def _pick_tile_b(B):
    """Largest multiple-of-8 divisor of B (<=128), preferring one that keeps
    >= 2 batch blocks so v7x's second TensorCore gets work.  Falls back to B
    itself (block == full dim keeps the (8,128) rule satisfied)."""
    cands = [d for d in range(8, min(B, 128) + 1, 8) if B % d == 0]
    split = [d for d in cands if B // d >= 2]
    if split:
        return max(split)
    if cands:
        return max(cands)
    return B


def _pick_tile_s(S, H, tile_b, fixed_bytes, vmem_cap):
    """Sequence rows per grid step.  Budget = physical VMEM - resident blocks -
    headroom, split over seq+seq2 x double-buffering plus an allowance for the
    in-kernel f32 temporaries; additionally capped at 4 MiB per operand per
    step, which is already >85% of the HBM roofline on all generations."""
    headroom = 8 << 20
    avail = max(vmem_cap - fixed_bytes - headroom, 4 << 20)
    per_operand = min(avail // 10, 4 << 20)
    max_s = max(8, (per_operand // (tile_b * H * 2) // 8) * 8)
    if S <= max_s:
        tile_s = _round_up(S, 8)
    else:
        n_steps = -(-S // max_s)
        tile_s = _round_up(-(-S // n_steps), 8)
    s_pad = _round_up(S, tile_s)
    return tile_s, s_pad


# ----------------------------------------------------------------------------
# Wrapper: fused MelBERT head
# ----------------------------------------------------------------------------
def melbert_head(seq, pooled, seq2, tmask, tmask2, params, num_labels,
                 *, tile_b=None, tile_s=None):
    B, S, H = seq.shape
    CH = params["w_spv_p"].shape[1]
    L = num_labels

    # Streamed activations in bf16; masks/pooled in f32 (0/1 masks are exact).
    seq = seq.astype(jnp.bfloat16)
    seq2 = seq2.astype(jnp.bfloat16)
    pooled = pooled.astype(jnp.float32)
    tm = tmask.astype(jnp.float32)[:, :, None]        # [B, S, 1]
    tm2 = tmask2.astype(jnp.float32)[:, :, None]      # [B, S, 1]

    w_spv_p = params["w_spv_p"].astype(jnp.bfloat16)
    w_spv_t = params["w_spv_t"].astype(jnp.bfloat16)
    w_mip_t2 = params["w_mip_t2"].astype(jnp.bfloat16)
    w_mip_t = params["w_mip_t"].astype(jnp.bfloat16)
    b_spv = params["b_spv"].astype(jnp.float32).reshape(1, CH)
    b_mip = params["b_mip"].astype(jnp.float32).reshape(1, CH)
    w_cls_spv = params["w_cls_spv"].astype(jnp.float32)
    w_cls_mip = params["w_cls_mip"].astype(jnp.float32)
    b_cls = params["b_cls"].astype(jnp.float32).reshape(1, L)

    vmem_cap = _vmem_capacity_bytes()
    if tile_b is None:
        tile_b = _pick_tile_b(B)

    # Bytes that stay resident in VMEM independent of tile_s (weights/biases
    # double-buffered by the pipeliner, pooled/output blocks, f32 accumulators).
    weight_bytes = 4 * H * CH * 2 + 2 * CH * 4 + 2 * CH * L * 4 + L * 4
    fixed_bytes = (2 * weight_bytes
                   + 2 * tile_b * H * 4            # pooled block
                   + 2 * tile_b * L * 4            # output block
                   + 2 * tile_b * H * 4)           # f32 accumulators (x2)

    if tile_s is None:
        tile_s, s_pad = _pick_tile_s(S, H, tile_b, fixed_bytes, vmem_cap)
    else:
        tile_s = _round_up(tile_s, 8)
        s_pad = _round_up(S, tile_s)

    # Zero-pad S: padded rows have mask 0 so the masked sum is unchanged, and
    # the .mean(1) divide uses the ORIGINAL S below.
    if s_pad != S:
        pad = ((0, 0), (0, s_pad - S), (0, 0))
        seq = jnp.pad(seq, pad)
        seq2 = jnp.pad(seq2, pad)
        tm = jnp.pad(tm, pad)
        tm2 = jnp.pad(tm2, pad)

    grid = (B // tile_b, s_pad // tile_s)

    seq_spec = pl.BlockSpec((tile_b, tile_s, H), lambda i, s: (i, s, 0))
    mask_spec = pl.BlockSpec((tile_b, tile_s, 1), lambda i, s: (i, s, 0))
    pooled_spec = pl.BlockSpec((tile_b, H), lambda i, s: (i, 0))
    w_hid_spec = pl.BlockSpec((H, CH), lambda i, s: (0, 0))
    b_hid_spec = pl.BlockSpec((1, CH), lambda i, s: (0, 0))
    w_cls_spec = pl.BlockSpec((CH, L), lambda i, s: (0, 0))
    b_cls_spec = pl.BlockSpec((1, L), lambda i, s: (0, 0))
    out_spec = pl.BlockSpec((tile_b, L), lambda i, s: (i, 0))

    bytes_accessed = (2 * B * s_pad * H * 2            # seq + seq2 (bf16)
                      + 2 * B * s_pad * 4              # masks (f32)
                      + B * H * 4 + weight_bytes + B * L * 4)
    flops = (2 * (2 * B * s_pad * H)                   # masked-sum pooling (x2)
             + 4 * (2 * B * H * CH)                    # SPV / MIP weight halves
             + 2 * (2 * B * CH * L))                   # classifier halves
    cost = pl.CostEstimate(flops=int(flops), transcendentals=int(B * (L + 1)),
                           bytes_accessed=int(bytes_accessed))

    stream_bytes = 2 * 2 * tile_b * tile_s * H * 2     # seq/seq2, double-buffered
    mask_bytes = 2 * 2 * tile_b * tile_s * 4           # mask tiles
    temp_bytes = 2 * 2 * tile_b * tile_s * H * 4       # f32 temporaries allowance
    vmem_est = stream_bytes + mask_bytes + temp_bytes + fixed_bytes
    # Never request more than the physical per-core VMEM (v7x = 64 MiB).
    vmem_limit = int(min(max(vmem_est * 3 // 2, 32 << 20), vmem_cap - (4 << 20)))

    kernel = functools.partial(_melbert_head_kernel, float(1.0 / S))
    return pl.pallas_call(
        kernel,
        out_shape=jax.ShapeDtypeStruct((B, L), jnp.float32),
        grid_spec=pltpu.PrefetchScalarGridSpec(
            num_scalar_prefetch=0,
            grid=grid,
            in_specs=[seq_spec, seq_spec, mask_spec, mask_spec, pooled_spec,
                      w_hid_spec, w_hid_spec, b_hid_spec,
                      w_hid_spec, w_hid_spec, b_hid_spec,
                      w_cls_spec, w_cls_spec, b_cls_spec],
            out_specs=out_spec,
            scratch_shapes=[pltpu.VMEM((tile_b, H), jnp.float32),
                            pltpu.VMEM((tile_b, H), jnp.float32)]),
        compiler_params=pltpu.CompilerParams(
            dimension_semantics=("parallel", "arbitrary"),
            vmem_limit_bytes=vmem_limit),
        cost_estimate=cost,
    )(seq, seq2, tm, tm2, pooled,
      w_spv_p, w_spv_t, b_spv,
      w_mip_t2, w_mip_t, b_mip,
      w_cls_spv, w_cls_mip, b_cls)


# ----------------------------------------------------------------------------
# Synthetic deterministic encoder (plain JAX glue, stands in for self.encoder).
# ----------------------------------------------------------------------------
def synthetic_encoder(input_ids, params):
    emb = params["embed"][input_ids]                                        # [B, S, H]
    seq = jnp.tanh(emb @ params["w_enc"] + params["b_enc"])                 # [B, S, H]
    pooled = jnp.tanh(seq[:, 0, :] @ params["w_pool"] + params["b_pool"])   # [B, H]
    # A real BERT encoder on TPU would emit bf16 activations; do the same so
    # the head streams half the HBM bytes.
    return seq.astype(jnp.bfloat16), pooled.astype(jnp.float32)


def init_params(key, vocab, hidden, classifier_hidden, num_labels, std=0.02):
    ks = jax.random.split(key, 9)

    def lin(k, fan_in, fan_out):
        return std * jax.random.normal(k, (fan_in, fan_out), jnp.float32)

    return {
        # synthetic encoder
        "embed": std * jax.random.normal(ks[0], (vocab, hidden), jnp.float32),
        "w_enc": lin(ks[1], hidden, hidden),
        "b_enc": jnp.zeros((hidden,), jnp.float32),
        "w_pool": lin(ks[2], hidden, hidden),
        "b_pool": jnp.zeros((hidden,), jnp.float32),
        # head weights: normal(0, initializer_range), zero bias (matches
        # _init_weights); stored pre-transposed [in, out] and pre-split along
        # the torch.cat boundaries (SPV: [pooled|target], MIP: [target_2|target],
        # classifier: [SPV_hidden|MIP_hidden]).
        "w_spv_p": lin(ks[3], hidden, classifier_hidden),
        "w_spv_t": lin(ks[4], hidden, classifier_hidden),
        "b_spv": jnp.zeros((classifier_hidden,), jnp.float32),
        "w_mip_t2": lin(ks[5], hidden, classifier_hidden),
        "w_mip_t": lin(ks[6], hidden, classifier_hidden),
        "b_mip": jnp.zeros((classifier_hidden,), jnp.float32),
        "w_cls_spv": lin(ks[7], classifier_hidden, num_labels),
        "w_cls_mip": lin(ks[8], classifier_hidden, num_labels),
        "b_cls": jnp.zeros((num_labels,), jnp.float32),
    }


def melbert_forward(input_ids, input_ids_2, target_mask, target_mask_2,
                    params, num_labels):
    # encoder pass 1 and 2 (glue); dropout = identity in eval
    seq, pooled = synthetic_encoder(input_ids, params)
    seq2, _ = synthetic_encoder(input_ids_2, params)
    return melbert_head(seq, pooled, seq2, target_mask, target_mask_2,
                        params, num_labels)


def melbert_head_ref(seq, pooled, seq2, tmask, tmask2, params):
    """Pure-JAX f32 reference of the head (module semantics)."""
    seq = seq.astype(jnp.float32)
    seq2 = seq2.astype(jnp.float32)
    pooled = pooled.astype(jnp.float32)
    tm = tmask.astype(jnp.float32)
    tm2 = tmask2.astype(jnp.float32)
    target = (seq * tm[:, :, None]).mean(axis=1)
    target2 = (seq2 * tm2[:, :, None]).mean(axis=1)
    w_spv = jnp.concatenate([params["w_spv_p"], params["w_spv_t"]], axis=0)
    w_mip = jnp.concatenate([params["w_mip_t2"], params["w_mip_t"]], axis=0)
    w_cls = jnp.concatenate([params["w_cls_spv"], params["w_cls_mip"]], axis=0)
    spv = jnp.concatenate([pooled, target], axis=1) @ w_spv + params["b_spv"]
    mip = jnp.concatenate([target2, target], axis=1) @ w_mip + params["b_mip"]
    logits = jnp.concatenate([spv, mip], axis=1) @ w_cls + params["b_cls"]
    return jax.nn.log_softmax(logits, axis=1)


if __name__ == "__main__":
    B, S, H, CH, L, VOCAB = 2, 8, 32, 32, 2, 50

    key = jax.random.PRNGKey(0)
    k_ids, k_ids2, k_t1, k_t2, k_p = jax.random.split(key, 5)

    # std boosted vs BERT's 0.02 so the check discriminates real bugs.
    params = init_params(k_p, VOCAB, H, CH, L, std=0.2)

    input_ids = jax.random.randint(k_ids, (B, S), 0, VOCAB, dtype=jnp.int32)
    input_ids_2 = jax.random.randint(k_ids2, (B, S), 0, VOCAB, dtype=jnp.int32)

    # one-hot target-word masks (1 for the target token, 0 otherwise)
    pos1 = jax.random.randint(k_t1, (B,), 0, S, dtype=jnp.int32)
    pos2 = jax.random.randint(k_t2, (B,), 0, S, dtype=jnp.int32)
    target_mask = jax.nn.one_hot(pos1, S, dtype=jnp.int32)
    target_mask_2 = jax.nn.one_hot(pos2, S, dtype=jnp.int32)

    out = melbert_forward(input_ids, input_ids_2, target_mask, target_mask_2,
                          params, L)
    out = jax.block_until_ready(out)

    seq, pooled = synthetic_encoder(input_ids, params)
    seq2, _ = synthetic_encoder(input_ids_2, params)
    ref = melbert_head_ref(seq, pooled, seq2, target_mask, target_mask_2, params)

    assert out.shape == (B, L)
    # kernel uses bf16 activations/weights for the big matmuls; compare loosely
    assert jnp.allclose(out, ref, atol=2e-2, rtol=2e-2), (out, ref)

    print("KERNEL_OK")
</pallas_src>

<mosaic_0001>
module attributes {stable_mosaic.version = 11 : i64} {
  func.func @_melbert_head_kernel(%arg0: i32, %arg1: i32, %arg2: memref<2x8x32xbf16, #tpu.memory_space<vmem>>, %arg3: memref<2x8x32xbf16, #tpu.memory_space<vmem>>, %arg4: memref<2x8x1xf32, #tpu.memory_space<vmem>>, %arg5: memref<2x8x1xf32, #tpu.memory_space<vmem>>, %arg6: memref<2x32xf32, #tpu.memory_space<vmem>>, %arg7: memref<32x32xbf16, #tpu.memory_space<vmem>>, %arg8: memref<32x32xbf16, #tpu.memory_space<vmem>>, %arg9: memref<1x32xf32, #tpu.memory_space<vmem>>, %arg10: memref<32x32xbf16, #tpu.memory_space<vmem>>, %arg11: memref<32x32xbf16, #tpu.memory_space<vmem>>, %arg12: memref<1x32xf32, #tpu.memory_space<vmem>>, %arg13: memref<32x2xf32, #tpu.memory_space<vmem>>, %arg14: memref<32x2xf32, #tpu.memory_space<vmem>>, %arg15: memref<1x2xf32, #tpu.memory_space<vmem>>, %arg16: memref<2x2xf32, #tpu.memory_space<vmem>>, %arg17: memref<2x32xf32, #tpu.memory_space<vmem>>, %arg18: memref<2x32xf32, #tpu.memory_space<vmem>>) attributes {dimension_semantics = [#tpu.dimension_semantics<parallel>, #tpu.dimension_semantics<arbitrary>], iteration_bounds = array<i64: 1, 1>, scalar_prefetch = 0 : i64, scratch_operands = 2 : i64, tpu.core_type = #tpu.core_type<tc>, window_params = [{transform_indices = @transform_0, window_bounds = array<i64: 2, 8, 32>}, {transform_indices = @transform_1, window_bounds = array<i64: 2, 8, 32>}, {transform_indices = @transform_2, window_bounds = array<i64: 2, 8, 1>}, {transform_indices = @transform_3, window_bounds = array<i64: 2, 8, 1>}, {transform_indices = @transform_4, window_bounds = array<i64: 2, 32>}, {pipeline_mode = #tpu.pipeline_mode<synchronous>, transform_indices = @transform_5, window_bounds = array<i64: 32, 32>}, {pipeline_mode = #tpu.pipeline_mode<synchronous>, transform_indices = @transform_6, window_bounds = array<i64: 32, 32>}, {pipeline_mode = #tpu.pipeline_mode<synchronous>, transform_indices = @transform_7, window_bounds = array<i64: 1, 32>}, {pipeline_mode = #tpu.pipeline_mode<synchronous>, transform_indices = @transform_8, window_bounds = array<i64: 32, 32>}, {pipeline_mode = #tpu.pipeline_mode<synchronous>, transform_indices = @transform_9, window_bounds = array<i64: 32, 32>}, {pipeline_mode = #tpu.pipeline_mode<synchronous>, transform_indices = @transform_10, window_bounds = array<i64: 1, 32>}, {pipeline_mode = #tpu.pipeline_mode<synchronous>, transform_indices = @transform_11, window_bounds = array<i64: 32, 2>}, {pipeline_mode = #tpu.pipeline_mode<synchronous>, transform_indices = @transform_12, window_bounds = array<i64: 32, 2>}, {pipeline_mode = #tpu.pipeline_mode<synchronous>, transform_indices = @transform_13, window_bounds = array<i64: 1, 2>}, {transform_indices = @transform_14, window_bounds = array<i64: 2, 2>}]} {
    %c0_i32 = arith.constant 0 : i32
    %0 = arith.cmpi eq, %arg1, %c0_i32 : i32
    %1 = arith.extui %0 : i1 to i32
    %c0_i32_0 = arith.constant 0 : i32
    %2 = arith.cmpi ne, %1, %c0_i32_0 : i32
    scf.if %2 {
      %cst_23 = arith.constant 0.000000e+00 : f32
      %24 = vector.broadcast %cst_23 : f32 to vector<2x32xf32>
      %c0_24 = arith.constant 0 : index
      %c0_25 = arith.constant 0 : index
      %25 = vector.load %arg17[%c0_24, %c0_25] : memref<2x32xf32, #tpu.memory_space<vmem>>, vector<2x32xf32>
      tpu.vector_store %arg17[%c0_24, %c0_25], %24 {strides = array<i32>} : memref<2x32xf32, #tpu.memory_space<vmem>>, vector<2x32xf32>,
      %cst_26 = arith.constant 0.000000e+00 : f32
      %26 = vector.broadcast %cst_26 : f32 to vector<2x32xf32>
      %c0_27 = arith.constant 0 : index
      %c0_28 = arith.constant 0 : index
      %27 = vector.load %arg18[%c0_27, %c0_28] : memref<2x32xf32, #tpu.memory_space<vmem>>, vector<2x32xf32>
      tpu.vector_store %arg18[%c0_27, %c0_28], %26 {strides = array<i32>} : memref<2x32xf32, #tpu.memory_space<vmem>>, vector<2x32xf32>,
    } else {
    }
    %c0 = arith.constant 0 : index
    %c0_1 = arith.constant 0 : index
    %c0_2 = arith.constant 0 : index
    %3 = vector.load %arg2[%c0, %c0_1, %c0_2] : memref<2x8x32xbf16, #tpu.memory_space<vmem>>, vector<2x8x32xbf16>
    %4 = arith.extf %3 : vector<2x8x32xbf16> to vector<2x8x32xf32>
    %c0_3 = arith.constant 0 : index
    %c0_4 = arith.constant 0 : index
    %c0_5 = arith.constant 0 : index
    %5 = vector.load %arg3[%c0_3, %c0_4, %c0_5] : memref<2x8x32xbf16, #tpu.memory_space<vmem>>, vector<2x8x32xbf16>
    %6 = arith.extf %5 : vector<2x8x32xbf16> to vector<2x8x32xf32>
    %c0_6 = arith.constant 0 : index
    %c0_7 = arith.constant 0 : index
    %c0_8 = arith.constant 0 : index
    %7 = vector.load %arg4[%c0_6, %c0_7, %c0_8] : memref<2x8x1xf32, #tpu.memory_space<vmem>>, vector<2x8x1xf32>
    %c0_9 = arith.constant 0 : index
    %c0_10 = arith.constant 0 : index
    %c0_11 = arith.constant 0 : index
    %8 = vector.load %arg5[%c0_9, %c0_10, %c0_11] : memref<2x8x1xf32, #tpu.memory_space<vmem>>, vector<2x8x1xf32>
    %c0_12 = arith.constant 0 : index
    %c0_13 = arith.constant 0 : index
    %9 = vector.load %arg17[%c0_12, %c0_13] : memref<2x32xf32, #tpu.memory_space<vmem>>, vector<2x32xf32>
    %10 = vector.broadcast %7 : vector<2x8x1xf32> to vector<2x8x32xf32>
    %11 = arith.mulf %4, %10 : vector<2x8x32xf32>
    %cst = arith.constant dense<0.000000e+00> : vector<2x32xf32>
    %12 = vector.multi_reduction <add>, %11, %cst [1] : vector<2x8x32xf32> to vector<2x32xf32>
    %13 = arith.addf %9, %12 : vector<2x32xf32>
    %c0_14 = arith.constant 0 : index
    %c0_15 = arith.constant 0 : index
    %14 = vector.load %arg17[%c0_14, %c0_15] : memref<2x32xf32, #tpu.memory_space<vmem>>, vector<2x32xf32>
    tpu.vector_store %arg17[%c0_14, %c0_15], %13 {strides = array<i32>} : memref<2x32xf32, #tpu.memory_space<vmem>>, vector<2x32xf32>,
    %c0_16 = arith.constant 0 : index
    %c0_17 = arith.constant 0 : index
    %15 = vector.load %arg18[%c0_16, %c0_17] : memref<2x32xf32, #tpu.memory_space<vmem>>, vector<2x32xf32>
    %16 = vector.broadcast %8 : vector<2x8x1xf32> to vector<2x8x32xf32>
    %17 = arith.mulf %6, %16 : vector<2x8x32xf32>
    %cst_18 = arith.constant dense<0.000000e+00> : vector<2x32xf32>
    %18 = vector.multi_reduction <add>, %17, %cst_18 [1] : vector<2x8x32xf32> to vector<2x32xf32>
    %19 = arith.addf %15, %18 : vector<2x32xf32>
    %c0_19 = arith.constant 0 : index
    %c0_20 = arith.constant 0 : index
    %20 = vector.load %arg18[%c0_19, %c0_20] : memref<2x32xf32, #tpu.memory_space<vmem>>, vector<2x32xf32>
    tpu.vector_store %arg18[%c0_19, %c0_20], %19 {strides = array<i32>} : memref<2x32xf32, #tpu.memory_space<vmem>>, vector<2x32xf32>,
    %c0_i32_21 = arith.constant 0 : i32
    %21 = arith.cmpi eq, %arg1, %c0_i32_21 : i32
    %22 = arith.extui %21 : i1 to i32
    %c0_i32_22 = arith.constant 0 : i32
    %23 = arith.cmpi ne, %22, %c0_i32_22 : i32
    scf.if %23 {
      %c0_23 = arith.constant 0 : index
      %c0_24 = arith.constant 0 : index
      %24 = vector.load %arg17[%c0_23, %c0_24] : memref<2x32xf32, #tpu.memory_space<vmem>>, vector<2x32xf32>
      %cst_25 = arith.constant 1.250000e-01 : f32
      %25 = vector.broadcast %cst_25 : f32 to vector<2x32xf32>
      %26 = arith.mulf %24, %25 : vector<2x32xf32>
      %c0_26 = arith.constant 0 : index
      %c0_27 = arith.constant 0 : index
      %27 = vector.load %arg18[%c0_26, %c0_27] : memref<2x32xf32, #tpu.memory_space<vmem>>, vector<2x32xf32>
      %cst_28 = arith.constant 1.250000e-01 : f32
      %28 = vector.broadcast %cst_28 : f32 to vector<2x32xf32>
      %29 = arith.mulf %27, %28 : vector<2x32xf32>
      %c0_29 = arith.constant 0 : index
      %c0_30 = arith.constant 0 : index
      %30 = vector.load %arg6[%c0_29, %c0_30] : memref<2x32xf32, #tpu.memory_space<vmem>>, vector<2x32xf32>
      %31 = arith.truncf %30 : vector<2x32xf32> to vector<2x32xbf16>
      %c0_31 = arith.constant 0 : index
      %c0_32 = arith.constant 0 : index
      %32 = vector.load %arg7[%c0_31, %c0_32] : memref<32x32xbf16, #tpu.memory_space<vmem>>, vector<32x32xbf16>
      %cst_33 = arith.constant dense<0.000000e+00> : vector<2x32xf32>
      %33 = tpu.matmul %31, %32, %cst_33 {dimension_numbers = #tpu.dot_dimension_numbers<[1], [0], [0], [1], [0, 0, 1, 1], [], []>} : vector<2x32xbf16>, vector<32x32xbf16>, vector<2x32xf32> -> vector<2x32xf32>
      %34 = arith.truncf %26 : vector<2x32xf32> to vector<2x32xbf16>
      %c0_34 = arith.constant 0 : index
      %c0_35 = arith.constant 0 : index
      %35 = vector.load %arg8[%c0_34, %c0_35] : memref<32x32xbf16, #tpu.memory_space<vmem>>, vector<32x32xbf16>
      %cst_36 = arith.constant dense<0.000000e+00> : vector<2x32xf32>
      %36 = tpu.matmul %34, %35, %cst_36 {dimension_numbers = #tpu.dot_dimension_numbers<[1], [0], [0], [1], [0, 0, 1, 1], [], []>} : vector<2x32xbf16>, vector<32x32xbf16>, vector<2x32xf32> -> vector<2x32xf32>
      %37 = arith.addf %33, %36 : vector<2x32xf32>
      %c0_37 = arith.constant 0 : index
      %c0_38 = arith.constant 0 : index
      %38 = vector.load %arg9[%c0_37, %c0_38] : memref<1x32xf32, #tpu.memory_space<vmem>>, vector<1x32xf32>
      %39 = vector.broadcast %38 : vector<1x32xf32> to vector<2x32xf32>
      %40 = arith.addf %37, %39 : vector<2x32xf32>
      %41 = arith.truncf %29 : vector<2x32xf32> to vector<2x32xbf16>
      %c0_39 = arith.constant 0 : index
      %c0_40 = arith.constant 0 : index
      %42 = vector.load %arg10[%c0_39, %c0_40] : memref<32x32xbf16, #tpu.memory_space<vmem>>, vector<32x32xbf16>
      %cst_41 = arith.constant dense<0.000000e+00> : vector<2x32xf32>
      %43 = tpu.matmul %41, %42, %cst_41 {dimension_numbers = #tpu.dot_dimension_numbers<[1], [0], [0], [1], [0, 0, 1, 1], [], []>} : vector<2x32xbf16>, vector<32x32xbf16>, vector<2x32xf32> -> vector<2x32xf32>
      %44 = arith.truncf %26 : vector<2x32xf32> to vector<2x32xbf16>
      %c0_42 = arith.constant 0 : index
      %c0_43 = arith.constant 0 : index
      %45 = vector.load %arg11[%c0_42, %c0_43] : memref<32x32xbf16, #tpu.memory_space<vmem>>, vector<32x32xbf16>
      %cst_44 = arith.constant dense<0.000000e+00> : vector<2x32xf32>
      %46 = tpu.matmul %44, %45, %cst_44 {dimension_numbers = #tpu.dot_dimension_numbers<[1], [0], [0], [1], [0, 0, 1, 1], [], []>} : vector<2x32xbf16>, vector<32x32xbf16>, vector<2x32xf32> -> vector<2x32xf32>
      %47 = arith.addf %43, %46 : vector<2x32xf32>
      %c0_45 = arith.constant 0 : index
      %c0_46 = arith.constant 0 : index
      %48 = vector.load %arg12[%c0_45, %c0_46] : memref<1x32xf32, #tpu.memory_space<vmem>>, vector<1x32xf32>
      %49 = vector.broadcast %48 : vector<1x32xf32> to vector<2x32xf32>
      %50 = arith.addf %47, %49 : vector<2x32xf32>
      %c0_47 = arith.constant 0 : index
      %c0_48 = arith.constant 0 : index
      %51 = vector.load %arg13[%c0_47, %c0_48] : memref<32x2xf32, #tpu.memory_space<vmem>>, vector<32x2xf32>
      %cst_49 = arith.constant dense<0.000000e+00> : vector<2x2xf32>
      %52 = tpu.matmul %40, %51, %cst_49 {dimension_numbers = #tpu.dot_dimension_numbers<[1], [0], [0], [1], [0, 0, 1, 1], [], []>} : vector<2x32xf32>, vector<32x2xf32>, vector<2x2xf32> -> vector<2x2xf32>
      %c0_50 = arith.constant 0 : index
      %c0_51 = arith.constant 0 : index
      %53 = vector.load %arg14[%c0_50, %c0_51] : memref<32x2xf32, #tpu.memory_space<vmem>>, vector<32x2xf32>
      %cst_52 = arith.constant dense<0.000000e+00> : vector<2x2xf32>
      %54 = tpu.matmul %50, %53, %cst_52 {dimension_numbers = #tpu.dot_dimension_numbers<[1], [0], [0], [1], [0, 0, 1, 1], [], []>} : vector<2x32xf32>, vector<32x2xf32>, vector<2x2xf32> -> vector<2x2xf32>
      %55 = arith.addf %52, %54 : vector<2x2xf32>
      %c0_53 = arith.constant 0 : index
      %c0_54 = arith.constant 0 : index
      %56 = vector.load %arg15[%c0_53, %c0_54] : memref<1x2xf32, #tpu.memory_space<vmem>>, vector<1x2xf32>
      %57 = vector.broadcast %56 : vector<1x2xf32> to vector<2x2xf32>
      %58 = arith.addf %55, %57 : vector<2x2xf32>
      %cst_55 = arith.constant dense<0xFF800000> : vector<2xf32>
      %59 = vector.multi_reduction <maximumf>, %58, %cst_55 [1] : vector<2x2xf32> to vector<2xf32>
      %60 = vector.shape_cast %59 : vector<2xf32> to vector<2x1xf32>
      %61 = vector.broadcast %60 : vector<2x1xf32> to vector<2x2xf32>
      %62 = arith.subf %58, %61 : vector<2x2xf32>
      %63 = math.exp %62 : vector<2x2xf32>
      %cst_56 = arith.constant dense<0.000000e+00> : vector<2xf32>
      %64 = vector.multi_reduction <add>, %63, %cst_56 [1] : vector<2x2xf32> to vector<2xf32>
      %65 = vector.shape_cast %64 : vector<2xf32> to vector<2x1xf32>
      %66 = math.log %65 : vector<2x1xf32>
      %67 = vector.broadcast %66 : vector<2x1xf32> to vector<2x2xf32>
      %68 = arith.subf %62, %67 : vector<2x2xf32>
      %c0_57 = arith.constant 0 : index
      %c0_58 = arith.constant 0 : index
      %69 = vector.load %arg16[%c0_57, %c0_58] : memref<2x2xf32, #tpu.memory_space<vmem>>, vector<2x2xf32>
      tpu.vector_store %arg16[%c0_57, %c0_58], %68 {strides = array<i32>} : memref<2x2xf32, #tpu.memory_space<vmem>>, vector<2x2xf32>,
    } else {
    }
    return
  }
  func.func @transform_0(%arg0: i32, %arg1: i32) -> (i32, i32, i32) {
    %c0_i32 = arith.constant 0 : i32
    %c0_i32_0 = arith.constant 0 : i32
    return %arg0, %arg1, %c0_i32 : i32, i32, i32
  }
  func.func @transform_1(%arg0: i32, %arg1: i32) -> (i32, i32, i32) {
    %c0_i32 = arith.constant 0 : i32
    %c0_i32_0 = arith.constant 0 : i32
    return %arg0, %arg1, %c0_i32 : i32, i32, i32
  }
  func.func @transform_2(%arg0: i32, %arg1: i32) -> (i32, i32, i32) {
    %c0_i32 = arith.constant 0 : i32
    %c0_i32_0 = arith.constant 0 : i32
    return %arg0, %arg1, %c0_i32 : i32, i32, i32
  }
  func.func @transform_3(%arg0: i32, %arg1: i32) -> (i32, i32, i32) {
    %c0_i32 = arith.constant 0 : i32
    %c0_i32_0 = arith.constant 0 : i32
    return %arg0, %arg1, %c0_i32 : i32, i32, i32
  }
  func.func @transform_4(%arg0: i32, %arg1: i32) -> (i32, i32) {
    %c0_i32 = arith.constant 0 : i32
    %c0_i32_0 = arith.constant 0 : i32
    return %arg0, %c0_i32 : i32, i32
  }
  func.func @transform_5(%arg0: i32, %arg1: i32) -> (i32, i32) {
    %c0_i32 = arith.constant 0 : i32
    %c0_i32_0 = arith.constant 0 : i32
    %c0_i32_1 = arith.constant 0 : i32
    return %c0_i32, %c0_i32_0 : i32, i32
  }
  func.func @transform_6(%arg0: i32, %arg1: i32) -> (i32, i32) {
    %c0_i32 = arith.constant 0 : i32
    %c0_i32_0 = arith.constant 0 : i32
    %c0_i32_1 = arith.constant 0 : i32
    return %c0_i32, %c0_i32_0 : i32, i32
  }
  func.func @transform_7(%arg0: i32, %arg1: i32) -> (i32, i32) {
    %c0_i32 = arith.constant 0 : i32
    %c0_i32_0 = arith.constant 0 : i32
    %c0_i32_1 = arith.constant 0 : i32
    return %c0_i32, %c0_i32_0 : i32, i32
  }
  func.func @transform_8(%arg0: i32, %arg1: i32) -> (i32, i32) {
    %c0_i32 = arith.constant 0 : i32
    %c0_i32_0 = arith.constant 0 : i32
    %c0_i32_1 = arith.constant 0 : i32
    return %c0_i32, %c0_i32_0 : i32, i32
  }
  func.func @transform_9(%arg0: i32, %arg1: i32) -> (i32, i32) {
    %c0_i32 = arith.constant 0 : i32
    %c0_i32_0 = arith.constant 0 : i32
    %c0_i32_1 = arith.constant 0 : i32
    return %c0_i32, %c0_i32_0 : i32, i32
  }
  func.func @transform_10(%arg0: i32, %arg1: i32) -> (i32, i32) {
    %c0_i32 = arith.constant 0 : i32
    %c0_i32_0 = arith.constant 0 : i32
    %c0_i32_1 = arith.constant 0 : i32
    return %c0_i32, %c0_i32_0 : i32, i32
  }
  func.func @transform_11(%arg0: i32, %arg1: i32) -> (i32, i32) {
    %c0_i32 = arith.constant 0 : i32
    %c0_i32_0 = arith.constant 0 : i32
    %c0_i32_1 = arith.constant 0 : i32
    return %c0_i32, %c0_i32_0 : i32, i32
  }
  func.func @transform_12(%arg0: i32, %arg1: i32) -> (i32, i32) {
    %c0_i32 = arith.constant 0 : i32
    %c0_i32_0 = arith.constant 0 : i32
    %c0_i32_1 = arith.constant 0 : i32
    return %c0_i32, %c0_i32_0 : i32, i32
  }
  func.func @transform_13(%arg0: i32, %arg1: i32) -> (i32, i32) {
    %c0_i32 = arith.constant 0 : i32
    %c0_i32_0 = arith.constant 0 : i32
    %c0_i32_1 = arith.constant 0 : i32
    return %c0_i32, %c0_i32_0 : i32, i32
  }
  func.func @transform_14(%arg0: i32, %arg1: i32) -> (i32, i32) {
    %c0_i32 = arith.constant 0 : i32
    %c0_i32_0 = arith.constant 0 : i32
    return %arg0, %c0_i32 : i32, i32
  }
}

</mosaic_0001>

<bundles_post_ra>
// kernel: tpu_custom_call.1
= control target key start
LH: loop header
LB: loop body
LE: loop exit
PB: predicated region body
PF: predicated region fallthrough
CT: control target
= control target key end

     0   :  { %v464_v2 = vmov 0   ;;  %s640_s0 = inlined_call_operand.vmem [shape: bf16[2,8,32], index: 0, kind: input, shape index: {}]   ;;  %s641_s1 = inlined_call_operand.vmem [shape: bf16[2,8,32], index: 1, kind: input, shape index: {}]   ;;  %s642_s2 = inlined_call_operand.vmem [shape: f32[2,8,1], index: 2, kind: input, shape index: {}]   ;;  %s643_s3 = inlined_call_operand.vmem [shape: f32[2,8,1], index: 3, kind: input, shape index: {}]   ;;  %s644_s4 = inlined_call_operand.vmem [shape: f32[2,32], index: 4, kind: input, shape index: {}]   ;;  %s645_s5 = inlined_call_operand.vmem [shape: bf16[32,32], index: 5, kind: input, shape index: {}]   ;;  %s646_s6 = inlined_call_operand.vmem [shape: bf16[32,32], index: 6, kind: input, shape index: {}]   ;;  %s647_s7 = inlined_call_operand.vmem [shape: f32[1,32], index: 7, kind: input, shape index: {}]   ;;  %s648_s8 = inlined_call_operand.vmem [shape: bf16[32,32], index: 8, kind: input, shape index: {}]   ;;  %s649_s9 = inlined_call_operand.vmem [shape: bf16[32,32], index: 9, kind: input, shape index: {}]   ;;  %s650_s10 = inlined_call_operand.vmem [shape: f32[1,32], index: 10, kind: input, shape index: {}]   ;;  %s651_s11 = inlined_call_operand.vmem [shape: f32[32,2], index: 11, kind: input, shape index: {}]   ;;  %s652_s12 = inlined_call_operand.vmem [shape: f32[32,2], index: 12, kind: input, shape index: {}]   ;;  %s653_s13 = inlined_call_operand.vmem [shape: f32[1,2], index: 13, kind: input, shape index: {}]   ;;  %s654_s14 = inlined_call_operand.hbm [shape: f32[2,2], index: 14, kind: output, shape index: {}]  }
   0x1   :  { %v66_v0 = vld [vmem:[%s643_s3] sm:$0xff]  ;;  %430 = vset.pattern.permute.xlu1 %v464_v2  ;;  %429 = vset.pattern.permute.xlu0 %v464_v2 }
   0x2   :  { %v64_v1 = vld [vmem:[%s642_s2] sm:$0xff]  ;;  %107 = vperm.xlu1 %430, %v66_v0  }
   0x3   :  { %71 = vperm.xlu0 %429, %v64_v1  }
   0x4   :  { %19 = vsyncpa [#allocation5], 0  ;;  %v67_v3 = vld [vmem:[%s643_s3 + $0x8] sm:$0xff]  ;;  %vm53_vm0 = vcmask 254976   ;;  %v465_v5 = vmov 0.0   ;;  %v423_v6 = vld [vmem:[%s641_s1] sm:$0xff]  }
   0x5   :  { %v65_v4 = vld [vmem:[%s642_s2 + $0x8] sm:$0xff]  ;;  %55 = vst.msk [vmem:[#allocation3] sm:$0x3] %vm53_vm0, %v465_v5  ;;  %v419_v7 = vld [vmem:[%s640_s0] sm:$0xff]   ;;  %v424_v11 = vunpack.c.l.bf16 %v423_v6  ;;  %vm81_vm1 = vcmask 261120   ;;  %v425_v28 = vunpack.c.h.bf16 %v423_v6  ;;  %v290_v34 = vld [vmem:[%s652_s12 + $0x18] sm:$0xff] }
   0x6   :  { %54 = vst.msk [vmem:[#allocation2] sm:$0x3] %vm53_vm0, %v465_v5  ;;  %v411_v8 = vld [vmem:[%s645_s5 + $0x8] sm:$0xff]  ;;  %v420_v12 = vunpack.c.l.bf16 %v419_v7  ;;  %v410_v14 = vld [vmem:[%s645_s5] sm:$0xff]  ;;  %v421_v29 = vunpack.c.h.bf16 %v419_v7  ;;  %v286_v35 = vld [vmem:[%s651_s11 + $0x18] sm:$0xff]  ;;  %vm98_vm2 = vcmask 1041409  }
   0x7   :  { %v413_v9 = vld [vmem:[%s646_s6 + $0x8] sm:$0xff]  ;;  %204 = vmatpush.bf16.msra.mxu1 %v411_v8  ;;  %v412_v15 = vld [vmem:[%s646_s6] sm:$0xff]  ;;  %v289_v8 = vld [vmem:[%s652_s12 + $0x10] sm:$0xff]  ;;  %vm342_vm3 = vcmask 9216   ;;  %s363_s19 = sshll.u32 %s654_s14, 4  ;;  %s364_s19 = int_to_ptr.hbm [resolvable:$true] %s363_s19 }
   0x8   :  { %v417_v10 = vld [vmem:[%s649_s9 + $0x8] sm:$0xff]  ;;  %176 = vmatpush.bf16.msra.mxu0 %v413_v9  ;;  %v144_v16 = vld [vmem:[%s644_s4] sm:$0x3]  ;;  %v285_v9 = vld [vmem:[%s651_s11 + $0x10] sm:$0xff] }
   0x9   :  { %v415_v13 = vld [vmem:[%s648_s8 + $0x8] sm:$0xff]  ;;  %243 = vmatpush.bf16.msra.mxu2 %v417_v10  ;;  %v416_v17 = vld [vmem:[%s649_s9] sm:$0xff]  ;;  %v145_v23 = vpack.c.bf16 %v144_v16, %v144_v16 }
   0xa   :  { %112 = vperm.xlu1 %430, %v67_v3   ;;  %271 = vmatpush.bf16.msra.mxu3 %v415_v13  ;;  %v414_v18 = vld [vmem:[%s648_s8] sm:$0xff] }
   0xb   :  { %76 = vperm.xlu0 %429, %v65_v4   ;;  %205 = vmatpush.bf16.msra.mxu1 %v410_v14  ;;  %v283_v13 = vld [vmem:[%s651_s11] sm:$0xff] }
   0xc   :  { %177 = vmatpush.bf16.msra.mxu0 %v412_v15  ;;  %v104_v58 = vld [vmem:[#allocation3] sm:$0x3]  ;;  %v431_v16 = vld [vmem:[%s647_s7] ss:$0 sm:$0xff] }
   0xd   :  { %244 = vmatpush.bf16.msra.mxu2 %v416_v17  ;;  %v68_v60 = vld [vmem:[#allocation2] sm:$0x3] }
   0xe   :  { %272 = vmatpush.bf16.msra.mxu3 %v414_v18  ;;  %389 = vmatmul.msk.bf16.vlgmr.msra.gmra.mxu1 %vm81_vm1, %v145_v23  ;;  %v287_v15 = vld [vmem:[%s652_s12] sm:$0xff] }
   0xf   :  { %329 = vmatpush.msrb.mxu1 %v286_v35 }
  0x10   :  { %306 = vmatpush.msrb.mxu0 %v290_v34 }
  0x11   :  { %330 = vmatpush.msrb.mxu1 %v285_v9 }
  0x12   :  { %307 = vmatpush.msrb.mxu0 %v289_v8 }
  0x74   :  { %v108_v19 = vpop.permute.xlu1 %107 }
  0x75   :  { %v72_v20 = vpop.permute.xlu0 %71  ;;  %v115_v21 = vmul.f32 %v424_v11, %v108_v19  ;;  %v284_v11 = vld [vmem:[%s651_s11 + $0x8] sm:$0xff] }
  0x76   :  { %v79_v22 = vmul.f32 %v420_v12, %v72_v20  ;;  %331 = vmatpush.msrb.mxu1 %v284_v11  ;;  %v288_v12 = vld [vmem:[%s652_s12 + $0x8] sm:$0xff] }
  0x77   :  { %v117_v24 = vsel %vm81_vm1, %v115_v21, 0.0  ;;  %308 = vmatpush.msrb.mxu0 %v288_v12  ;;  %v432_v21 = vld [vmem:[%s650_s10] ss:$0 sm:$0xff]  ;;  %s466_s10 = smov [#allocation4]  }
  0x78   :  { %v82_v25 = vsel %vm81_vm1, %v79_v22, 0.0  ;;  %v118_v26 = vrot.slane %v117_v24, 4  ;;  %332 = vmatpush.msrb.mxu1 %v283_v13 }
  0x79   :  { %v83_v27 = vrot.slane %v82_v25, 4  ;;  %309 = vmatpush.msrb.mxu0 %v287_v15 }
  0x7a   :  { %v119_v30 = vadd.f32 %v118_v26, %v117_v24 }
  0x7b   :  { %v84_v31 = vadd.f32 %v83_v27, %v82_v25 }
  0x7c   :  { %v113_v32 = vpop.permute.xlu1 %112  ;;  %v120_v38 = vrot.slane %v119_v30, 2 }
  0x7d   :  { %v77_v33 = vpop.permute.xlu0 %76  ;;  %v116_v36 = vmul.f32 %v425_v28, %v113_v32  ;;  %v85_v39 = vrot.slane %v84_v31, 2  ;;  %v433_v28 = vld [vmem:[%s653_s13] ss:$0 sm:$0xff]  ;;  %s361_s13 = sshll.u32 %s466_s10, 4  ;;  %s362_s13 = int_to_ptr.vmem [resolvable:$true] %s361_s13 }
  0x7e   :  { %v80_v37 = vmul.f32 %v421_v29, %v77_v33  ;;  %v121_v44 = vadd.f32 %v120_v38, %v119_v30 }
  0x7f   :  { %v124_v40 = vsel %vm81_vm1, %v116_v36, 0.0  ;;  %v86_v45 = vadd.f32 %v85_v39, %v84_v31 }
  0x80   :  { %v89_v41 = vsel %vm81_vm1, %v80_v37, 0.0  ;;  %v125_v42 = vrot.slane %v124_v40, 4  ;;  %v122_v50 = vrot.slane %v121_v44, 1 }
  0x81   :  { %v90_v43 = vrot.slane %v89_v41, 4  ;;  %v87_v51 = vrot.slane %v86_v45, 1 }
  0x82   :  { %v126_v46 = vadd.f32 %v125_v42, %v124_v40  ;;  %v123_v56 = vadd.f32 %v122_v50, %v121_v44 }
  0x83   :  { %v91_v47 = vadd.f32 %v90_v43, %v89_v41  ;;  %v88_v57 = vadd.f32 %v87_v51, %v86_v45 }
  0x84   :  { %v127_v48 = vrot.slane %v126_v46, 2 }
  0x85   :  { %v92_v49 = vrot.slane %v91_v47, 2 }
  0x86   :  { %v128_v52 = vadd.f32 %v127_v48, %v126_v46 }
  0x87   :  { %v93_v53 = vadd.f32 %v92_v49, %v91_v47 }
  0x88   :  { %v129_v54 = vrot.slane %v128_v52, 1 }
  0x89   :  { %v94_v55 = vrot.slane %v93_v53, 1 }
  0x8a   :  { %v130_v59 = vadd.f32 %v129_v54, %v128_v52 }
  0x8b   :  { %v95_v61 = vadd.f32 %v94_v55, %v93_v53  ;;  %v207_v10 = vpop.f32.mrf.mxu1 }
  0x8c   :  { %v133_v62 = vsel %vm98_vm2, %v130_v59, %v123_v56 }
  0x8d   :  { %v99_v63 = vsel %vm98_vm2, %v95_v61, %v88_v57  ;;  %v135_v0 = vadd.f32 %v133_v62, %v104_v58 }
  0x8e   :  { %v101_v1 = vadd.f32 %v99_v63, %v68_v60 }
  0x8f   :  { %136 = vst.msk [vmem:[#allocation3] sm:$0x3] %vm53_vm0, %v135_v0 }
  0x90   :  { %103 = vst.msk [vmem:[#allocation2] sm:$0x3] %vm53_vm0, %v101_v1 }
  0x93   :  { %v209_v14 = vpop.f32.mrf.mxu1 }
  0x96   :  { %v142_v2 = vld [vmem:[#allocation3] sm:$0x3] }
  0x97   :  { %v140_v3 = vld [vmem:[#allocation2] sm:$0x3]  ;;  %v143_v4 = vmul.f32 0.125, %v142_v2 }
  0x98   :  { %v141_v5 = vmul.f32 0.125, %v140_v3 }
  0x99   :  { %v216_v6 = vpack.c.bf16 %v143_v4, %v143_v4 }
  0x9a   :  { %v150_v7 = vpack.c.bf16 %v141_v5, %v141_v5 }
  0x9b   :  { %407 = vmatmul.msk.bf16.vlgmr.msra.gmra.mxu3 %vm81_vm1, %v216_v6 }
  0x9c   :  { %380 = vmatmul.msk.bf16.vlgmr.msra.gmra.mxu0 %vm81_vm1, %v150_v7  ;;  %398 = vmatmul.msk.bf16.vlgmr.msra.gmra.mxu2 %vm81_vm1, %v150_v7 }
 0x119   :  { %v179_v17 = vpop.f32.mrf.mxu0 }
 0x11a   :  { %v208_v18 = vadd.f32 %v207_v10, %v179_v17 }
 0x11c   :  { %v215_v19 = vadd.f32 %v431_v16, %v208_v18 }
 0x11e   :  { %409 = vmatmul.msk.f32.vlgmr.msrb.gmra.mxu1 %vm81_vm1, %v215_v19  ;;  %v274_v20 = vpop.f32.mrf.mxu3 }
 0x11f   :  { %v246_v22 = vpop.f32.mrf.mxu2 }
 0x120   :  { %v275_v23 = vadd.f32 %v274_v20, %v246_v22 }
 0x121   :  { %v181_v24 = vpop.f32.mrf.mxu0 }
 0x122   :  { %v282_v25 = vadd.f32 %v432_v21, %v275_v23 }
 0x124   :  { %408 = vmatmul.msk.f32.vlgmr.msrb.gmra.mxu0 %vm81_vm1, %v282_v25 }
 0x126   :  { %v276_v26 = vpop.f32.mrf.mxu3 }
 0x127   :  { %v248_v27 = vpop.f32.mrf.mxu2 }
 0x19b   :  { %v334_v29 = vpop.f32.mrf.mxu1 }
 0x1a1   :  { %v311_v30 = vpop.f32.mrf.mxu0 }
 0x1a2   :  { %v335_v31 = vadd.f32 %v334_v29, %v311_v30 }
 0x1a4   :  { %v341_v32 = vadd.f32 %v433_v28, %v335_v31 }
 0x1a6   :  { %v343_v33 = vsel %vm342_vm3, %v341_v32, -inf }
 0x1a7   :  { %344 = vmax.xlane.f32.xlu2 %v343_v33 }
 0x21a   :  { %v345_v34 = vpop.xlane.xlu2 %344 }
 0x21b   :  { %v346_v35 = vsub.f32 %v341_v32, %v345_v34 }
 0x21d   :  { %v347_v36 = vmul.f32 1.442695, %v346_v35 }
 0x21f   :  { %434 = vpow2.f32 %v347_v36 }
 0x225   :  { %v435_v37 = vpop.eup %434 }
 0x226   :  { %v349_v38 = vsel %vm342_vm3, %v435_v37, 0.0 }
 0x227   :  { %350 = vadd.xlane.f32.xlu2 %v349_v38 }
 0x29a   :  { %v351_v39 = vpop.xlane.xlu2 %350 }
 0x29b   :  { %436 = vlog2.f32 %v351_v39 }
 0x2a1   :  { %v437_v40 = vpop.eup %436 }
 0x2a2   :  { %v353_v41 = vmul.f32 0.6931472, %v437_v40 }
 0x2a4   :  { %v354_v42 = vsub.f32 %v346_v35, %v353_v41 }
 0x2a6   :  { %355 = vst.msk [vmem:[#allocation4] sm:$0x3] %vm342_vm3, %v354_v42 }
 0x2a7   :  { %366 = dma.vmem_to_hbm [thread:$0]  %s362_s13, 32, %s364_s19, [#allocation5]  }
 0x2a8   :  { %462 = dma.done.wait [#allocation5], 32  }
 0x2a9   :  { %463 = vsyncadd [#allocation5], 4294967264 }
 0x2aa   :  { %371 = vsyncpa [#allocation5], 1 }

</bundles_post_ra>
